<compile_context>
chip_gen: v6e
topology: v6e:2x2x1
jax: 0.10.0
libtpu: 0.0.40
codegen_flags: <defaults>
</compile_context>

<pallas_src>
import jax
import jax.numpy as jnp
import numpy as np
from jax.experimental import pallas as pl
from jax.experimental.pallas import tpu as pltpu


# ----------------------------- Pallas kernel --------------------------------
def gnnflow_kernel(adj_ref, x_ref,
                   w1_ref, b1_ref, w2_ref, b2_ref, w3_ref, b3_ref,
                   wfc_ref, bfc_ref, out_ref):
    """One grid step = one group of Bt graphs packed block-diagonally.

    adj_ref : (M, M)   bf16 block-diagonal normalized adjacency, M = Bt*N
    x_ref   : (M, Fin) bf16 stacked node features
    w*_ref  : bf16 weights; b*_ref: (1, dout) f32 biases
    out_ref : (M, F_pad) f32 fc output, lane-padded to a multiple of 128
    """
    adj = adj_ref[...]                      # bf16
    h = x_ref[...]                          # bf16

    def gcn_conv(h_bf16, w_ref, b_ref):
        # (A @ H) @ W == A @ (H W): aggregate in the narrow feature width
        # first, then project.  Both are plain 2-D MXU matmuls with f32
        # accumulation; bias + ReLU stay f32 on the VPU (v5e-safe).
        agg = jnp.dot(adj, h_bf16, preferred_element_type=jnp.float32)
        proj = jnp.dot(agg.astype(jnp.bfloat16), w_ref[...],
                       preferred_element_type=jnp.float32) + b_ref[...]
        return jnp.maximum(proj, 0.0)

    # GCNConv 1..3 with ReLU (re-feed the MXU in bf16 each layer).
    h = gcn_conv(h, w1_ref, b1_ref).astype(jnp.bfloat16)
    h = gcn_conv(h, w2_ref, b2_ref).astype(jnp.bfloat16)
    h = gcn_conv(h, w3_ref, b3_ref).astype(jnp.bfloat16)

    # fc (node-wise Linear, no activation); lane-dense (F_pad % 128 == 0) store.
    out = jnp.dot(h, wfc_ref[...], preferred_element_type=jnp.float32) \
          + bfc_ref[...]
    out_ref[...] = out.astype(out_ref.dtype)


# ------------------------------ glue (JAX) -----------------------------------
def build_normalized_adj(edge_index, num_nodes):
    """PyG GCNConv-style symmetric normalization with self loops.

    edge_index: (2, E) int array; edge_index[0]=source j, edge_index[1]=target i.
    Returns A_norm with A_norm[i, j] = d_i^{-1/2} * A_hat[i, j] * d_j^{-1/2}.
    """
    src = edge_index[0]
    dst = edge_index[1]
    a = jnp.zeros((num_nodes, num_nodes), jnp.float32)
    a = a.at[dst, src].add(1.0)                       # message j -> i
    a = a + jnp.eye(num_nodes, dtype=jnp.float32)     # add self loops
    deg = a.sum(axis=1)
    dinv = jnp.where(deg > 0, jax.lax.rsqrt(deg), 0.0)
    return dinv[:, None] * a * dinv[None, :]


def init_params(key, fin, features_dim):
    dims = [(fin, 16), (16, 32), (32, 64), (64, features_dim)]
    params = []
    for i, (din, dout) in enumerate(dims):
        k_w, k_b = jax.random.split(jax.random.fold_in(key, i))
        scale = 1.0 / np.sqrt(din)
        w = jax.random.uniform(k_w, (din, dout), jnp.float32, -scale, scale)
        b = jax.random.uniform(k_b, (1, dout), jnp.float32, -scale, scale)
        params += [w, b]
    return params


def _choose_bt(B, N, target_rows=256, max_adj_block_bytes=4 << 20):
    """Graphs per grid step.

    Fill >= 256 MXU rows (v6e/v7x MXU is 2x256^2), keep the double-buffered
    bf16 adjacency block <= 4 MiB so the whole pipelined working set fits
    v5e's 16 MiB scoped-VMEM default (v6e: 32 MiB, v7x: 64 MiB physical), and
    keep >= 2 grid steps where possible so v7x can shard across its 2 TCs.
    """
    Bt = max(1, pl.cdiv(target_rows, N))
    Bt = min(Bt, max(1, B))                            # don't pad past the batch
    while Bt > 1 and (Bt * N) * (Bt * N) * 2 > max_adj_block_bytes:
        Bt //= 2
    while Bt > 1 and pl.cdiv(B, Bt) < 2 and (Bt // 2) * N >= 128:
        Bt //= 2
    return Bt


def gnnflow_forward(x, edge_index, params, features_dim, block_graphs=None):
    """x: (B, N, Fin) float32, edge_index: (B, 2, E) int32.

    Returns (B*N, features_dim), matching the PyTorch output (fc applied per
    node of the PyG Batch of B graphs).
    """
    B, N, fin = x.shape
    w1, b1, w2, b2, w3, b3, wfc, bfc = params

    adj = jax.vmap(lambda ei: build_normalized_adj(ei, N))(edge_index)  # (B,N,N)

    Bt = _choose_bt(B, N) if block_graphs is None else block_graphs
    G = pl.cdiv(B, Bt)
    Bp = G * Bt
    if Bp != B:
        pad = Bp - B
        adj = jnp.pad(adj, ((0, pad), (0, 0), (0, 0)))
        x = jnp.pad(x, ((0, pad), (0, 0), (0, 0)))
    M = Bt * N

    # Pack each group of Bt graphs into a block-diagonal (M, M) adjacency and
    # stack features to (M, fin); cast the big streams to bf16 for the MXU.
    adj_g = adj.reshape(G, Bt, N, N)
    eye = jnp.eye(Bt, dtype=adj.dtype)
    adj_bd = jnp.einsum('gbnm,bc->gbncm', adj_g, eye).reshape(G, M, M)
    adj_bd = adj_bd.astype(jnp.bfloat16)
    x_g = x.reshape(G, M, fin).astype(jnp.bfloat16)

    # bf16 weights for the MXU; biases stay f32 for the VPU.
    w1b, w2b, w3b = (w.astype(jnp.bfloat16) for w in (w1, w2, w3))

    # Lane-dense output: pad fc width to a multiple of 128.
    F_pad = pl.cdiv(features_dim, 128) * 128
    if F_pad != features_dim:
        wfc_p = jnp.pad(wfc, ((0, 0), (0, F_pad - features_dim)))
        bfc_p = jnp.pad(bfc, ((0, 0), (0, F_pad - features_dim)))
    else:
        wfc_p, bfc_p = wfc, bfc
    wfc_b = wfc_p.astype(jnp.bfloat16)

    def weight_spec(a):
        return pl.BlockSpec(a.shape, lambda g: (0, 0))

    # Advisory cost estimate so XLA schedules the adjacency-build scatter and
    # the kernel sensibly.
    h1, h2, h3 = 16, 32, 64
    flops_per_group = 2 * M * (M * (fin + h1 + h2)
                               + fin * h1 + h1 * h2 + h2 * h3 + h3 * F_pad)
    weight_bytes = sum(int(np.prod(p.shape)) * p.dtype.itemsize
                       for p in (w1b, b1, w2b, b2, w3b, b3, wfc_b, bfc_p))
    cost = pl.CostEstimate(
        flops=int(G * flops_per_group),
        transcendentals=0,
        bytes_accessed=int(adj_bd.size * 2 + x_g.size * 2
                           + G * M * F_pad * 4 + weight_bytes))

    out = pl.pallas_call(
        gnnflow_kernel,
        out_shape=jax.ShapeDtypeStruct((G, M, F_pad), jnp.float32),
        grid_spec=pltpu.PrefetchScalarGridSpec(
            num_scalar_prefetch=0,
            grid=(G,),
            in_specs=[
                pl.BlockSpec((None, M, M), lambda g: (g, 0, 0)),
                pl.BlockSpec((None, M, fin), lambda g: (g, 0, 0)),
                weight_spec(w1b), weight_spec(b1),
                weight_spec(w2b), weight_spec(b2),
                weight_spec(w3b), weight_spec(b3),
                weight_spec(wfc_b), weight_spec(bfc_p),
            ],
            out_specs=pl.BlockSpec((None, M, F_pad), lambda g: (g, 0, 0)),
        ),
        compiler_params=pltpu.CompilerParams(
            dimension_semantics=("parallel",)),
        cost_estimate=cost,
    )(adj_bd, x_g, w1b, b1, w2b, b2, w3b, b3, wfc_b, bfc_p)

    out = out.reshape(Bp, N, F_pad)[:B, :, :features_dim]
    return out.reshape(B * N, features_dim)


def gnnflow_reference(x, edge_index, params, features_dim):
    """Pure-JAX f32 reference of the same forward pass (for checking)."""
    B, N, _ = x.shape
    w1, b1, w2, b2, w3, b3, wfc, bfc = params

    def per_graph(xg, ei):
        a = build_normalized_adj(ei, N)
        h = jnp.maximum(a @ (xg @ w1) + b1, 0.0)
        h = jnp.maximum(a @ (h @ w2) + b2, 0.0)
        h = jnp.maximum(a @ (h @ w3) + b3, 0.0)
        return h @ wfc + bfc

    out = jax.vmap(per_graph)(x, edge_index)
    return out.reshape(B * N, features_dim)


if __name__ == "__main__":
    key = jax.random.PRNGKey(0)
    B, N, FIN, E = 2, 8, 8, 12       # batch of graphs, nodes, feat dim, edges
    FEATURES_DIM = 64

    k_x, k_src, k_off, k_p = jax.random.split(key, 4)
    x = jax.random.normal(k_x, (B, N, FIN), jnp.float32)
    src = jax.random.randint(k_src, (B, 1, E), 0, N, jnp.int32)
    off = jax.random.randint(k_off, (B, 1, E), 1, N, jnp.int32)
    dst = (src + off) % N                         # no self loops in raw edges
    edge_index = jnp.concatenate([src, dst], axis=1)   # (B, 2, E)

    params = init_params(k_p, FIN, FEATURES_DIM)

    out = gnnflow_forward(x, edge_index, params, FEATURES_DIM)
    out = jax.block_until_ready(out)

    # Kernel runs the matmuls in bf16 (f32 accumulation); compare against the
    # f32 reference with a bf16-appropriate tolerance.
    ref = gnnflow_reference(x, edge_index, params, FEATURES_DIM)
    np.testing.assert_allclose(np.asarray(out), np.asarray(ref),
                               rtol=5e-2, atol=5e-2)
    assert out.shape == (B * N, FEATURES_DIM)
    print("KERNEL_OK")
</pallas_src>

<mosaic_0001>
module attributes {stable_mosaic.version = 11 : i64} {
  func.func @gnnflow_kernel(%arg0: i32, %arg1: memref<1x16x16xbf16, #tpu.memory_space<vmem>>, %arg2: memref<1x16x8xbf16, #tpu.memory_space<vmem>>, %arg3: memref<8x16xbf16, #tpu.memory_space<vmem>>, %arg4: memref<1x16xf32, #tpu.memory_space<vmem>>, %arg5: memref<16x32xbf16, #tpu.memory_space<vmem>>, %arg6: memref<1x32xf32, #tpu.memory_space<vmem>>, %arg7: memref<32x64xbf16, #tpu.memory_space<vmem>>, %arg8: memref<1x64xf32, #tpu.memory_space<vmem>>, %arg9: memref<64x128xbf16, #tpu.memory_space<vmem>>, %arg10: memref<1x128xf32, #tpu.memory_space<vmem>>, %arg11: memref<1x16x128xf32, #tpu.memory_space<vmem>>) attributes {dimension_semantics = [#tpu.dimension_semantics<parallel>], iteration_bounds = array<i64: 1>, scalar_prefetch = 0 : i64, scratch_operands = 0 : i64, tpu.core_type = #tpu.core_type<tc>, window_params = [{transform_indices = @transform_0, window_bounds = array<i64: 1, 16, 16>}, {transform_indices = @transform_1, window_bounds = array<i64: 1, 16, 8>}, {pipeline_mode = #tpu.pipeline_mode<synchronous>, transform_indices = @transform_2, window_bounds = array<i64: 8, 16>}, {pipeline_mode = #tpu.pipeline_mode<synchronous>, transform_indices = @transform_3, window_bounds = array<i64: 1, 16>}, {pipeline_mode = #tpu.pipeline_mode<synchronous>, transform_indices = @transform_4, window_bounds = array<i64: 16, 32>}, {pipeline_mode = #tpu.pipeline_mode<synchronous>, transform_indices = @transform_5, window_bounds = array<i64: 1, 32>}, {pipeline_mode = #tpu.pipeline_mode<synchronous>, transform_indices = @transform_6, window_bounds = array<i64: 32, 64>}, {pipeline_mode = #tpu.pipeline_mode<synchronous>, transform_indices = @transform_7, window_bounds = array<i64: 1, 64>}, {pipeline_mode = #tpu.pipeline_mode<synchronous>, transform_indices = @transform_8, window_bounds = array<i64: 64, 128>}, {pipeline_mode = #tpu.pipeline_mode<synchronous>, transform_indices = @transform_9, window_bounds = array<i64: 1, 128>}, {transform_indices = @transform_10, window_bounds = array<i64: 1, 16, 128>}]} {
    %c0 = arith.constant 0 : index
    %c0_0 = arith.constant 0 : index
    %c0_1 = arith.constant 0 : index
    %0 = vector.load %arg1[%c0, %c0_0, %c0_1] : memref<1x16x16xbf16, #tpu.memory_space<vmem>>, vector<1x16x16xbf16>
    %1 = vector.shape_cast %0 : vector<1x16x16xbf16> to vector<16x16xbf16>
    %c0_2 = arith.constant 0 : index
    %c0_3 = arith.constant 0 : index
    %c0_4 = arith.constant 0 : index
    %2 = vector.load %arg2[%c0_2, %c0_3, %c0_4] : memref<1x16x8xbf16, #tpu.memory_space<vmem>>, vector<1x16x8xbf16>
    %3 = vector.shape_cast %2 : vector<1x16x8xbf16> to vector<16x8xbf16>
    %cst = arith.constant dense<0.000000e+00> : vector<16x8xf32>
    %4 = tpu.matmul %1, %3, %cst {dimension_numbers = #tpu.dot_dimension_numbers<[1], [0], [0], [1], [0, 0, 1, 1], [], []>} : vector<16x16xbf16>, vector<16x8xbf16>, vector<16x8xf32> -> vector<16x8xf32>
    %5 = arith.truncf %4 : vector<16x8xf32> to vector<16x8xbf16>
    %c0_5 = arith.constant 0 : index
    %c0_6 = arith.constant 0 : index
    %6 = vector.load %arg3[%c0_5, %c0_6] : memref<8x16xbf16, #tpu.memory_space<vmem>>, vector<8x16xbf16>
    %cst_7 = arith.constant dense<0.000000e+00> : vector<16x16xf32>
    %7 = tpu.matmul %5, %6, %cst_7 {dimension_numbers = #tpu.dot_dimension_numbers<[1], [0], [0], [1], [0, 0, 1, 1], [], []>} : vector<16x8xbf16>, vector<8x16xbf16>, vector<16x16xf32> -> vector<16x16xf32>
    %c0_8 = arith.constant 0 : index
    %c0_9 = arith.constant 0 : index
    %8 = vector.load %arg4[%c0_8, %c0_9] : memref<1x16xf32, #tpu.memory_space<vmem>>, vector<1x16xf32>
    %9 = vector.broadcast %8 : vector<1x16xf32> to vector<16x16xf32>
    %10 = arith.addf %7, %9 : vector<16x16xf32>
    %cst_10 = arith.constant 0.000000e+00 : f32
    %11 = vector.broadcast %cst_10 : f32 to vector<16x16xf32>
    %12 = arith.maximumf %10, %11 : vector<16x16xf32>
    %13 = arith.truncf %12 : vector<16x16xf32> to vector<16x16xbf16>
    %cst_11 = arith.constant dense<0.000000e+00> : vector<16x16xf32>
    %14 = tpu.matmul %1, %13, %cst_11 {dimension_numbers = #tpu.dot_dimension_numbers<[1], [0], [0], [1], [0, 0, 1, 1], [], []>} : vector<16x16xbf16>, vector<16x16xbf16>, vector<16x16xf32> -> vector<16x16xf32>
    %15 = arith.truncf %14 : vector<16x16xf32> to vector<16x16xbf16>
    %c0_12 = arith.constant 0 : index
    %c0_13 = arith.constant 0 : index
    %16 = vector.load %arg5[%c0_12, %c0_13] : memref<16x32xbf16, #tpu.memory_space<vmem>>, vector<16x32xbf16>
    %cst_14 = arith.constant dense<0.000000e+00> : vector<16x32xf32>
    %17 = tpu.matmul %15, %16, %cst_14 {dimension_numbers = #tpu.dot_dimension_numbers<[1], [0], [0], [1], [0, 0, 1, 1], [], []>} : vector<16x16xbf16>, vector<16x32xbf16>, vector<16x32xf32> -> vector<16x32xf32>
    %c0_15 = arith.constant 0 : index
    %c0_16 = arith.constant 0 : index
    %18 = vector.load %arg6[%c0_15, %c0_16] : memref<1x32xf32, #tpu.memory_space<vmem>>, vector<1x32xf32>
    %19 = vector.broadcast %18 : vector<1x32xf32> to vector<16x32xf32>
    %20 = arith.addf %17, %19 : vector<16x32xf32>
    %cst_17 = arith.constant 0.000000e+00 : f32
    %21 = vector.broadcast %cst_17 : f32 to vector<16x32xf32>
    %22 = arith.maximumf %20, %21 : vector<16x32xf32>
    %23 = arith.truncf %22 : vector<16x32xf32> to vector<16x32xbf16>
    %cst_18 = arith.constant dense<0.000000e+00> : vector<16x32xf32>
    %24 = tpu.matmul %1, %23, %cst_18 {dimension_numbers = #tpu.dot_dimension_numbers<[1], [0], [0], [1], [0, 0, 1, 1], [], []>} : vector<16x16xbf16>, vector<16x32xbf16>, vector<16x32xf32> -> vector<16x32xf32>
    %25 = arith.truncf %24 : vector<16x32xf32> to vector<16x32xbf16>
    %c0_19 = arith.constant 0 : index
    %c0_20 = arith.constant 0 : index
    %26 = vector.load %arg7[%c0_19, %c0_20] : memref<32x64xbf16, #tpu.memory_space<vmem>>, vector<32x64xbf16>
    %cst_21 = arith.constant dense<0.000000e+00> : vector<16x64xf32>
    %27 = tpu.matmul %25, %26, %cst_21 {dimension_numbers = #tpu.dot_dimension_numbers<[1], [0], [0], [1], [0, 0, 1, 1], [], []>} : vector<16x32xbf16>, vector<32x64xbf16>, vector<16x64xf32> -> vector<16x64xf32>
    %c0_22 = arith.constant 0 : index
    %c0_23 = arith.constant 0 : index
    %28 = vector.load %arg8[%c0_22, %c0_23] : memref<1x64xf32, #tpu.memory_space<vmem>>, vector<1x64xf32>
    %29 = vector.broadcast %28 : vector<1x64xf32> to vector<16x64xf32>
    %30 = arith.addf %27, %29 : vector<16x64xf32>
    %cst_24 = arith.constant 0.000000e+00 : f32
    %31 = vector.broadcast %cst_24 : f32 to vector<16x64xf32>
    %32 = arith.maximumf %30, %31 : vector<16x64xf32>
    %33 = arith.truncf %32 : vector<16x64xf32> to vector<16x64xbf16>
    %c0_25 = arith.constant 0 : index
    %c0_26 = arith.constant 0 : index
    %34 = vector.load %arg9[%c0_25, %c0_26] : memref<64x128xbf16, #tpu.memory_space<vmem>>, vector<64x128xbf16>
    %cst_27 = arith.constant dense<0.000000e+00> : vector<16x128xf32>
    %35 = tpu.matmul %33, %34, %cst_27 {dimension_numbers = #tpu.dot_dimension_numbers<[1], [0], [0], [1], [0, 0, 1, 1], [], []>} : vector<16x64xbf16>, vector<64x128xbf16>, vector<16x128xf32> -> vector<16x128xf32>
    %c0_28 = arith.constant 0 : index
    %c0_29 = arith.constant 0 : index
    %36 = vector.load %arg10[%c0_28, %c0_29] : memref<1x128xf32, #tpu.memory_space<vmem>>, vector<1x128xf32>
    %37 = vector.broadcast %36 : vector<1x128xf32> to vector<16x128xf32>
    %38 = arith.addf %35, %37 : vector<16x128xf32>
    %c0_30 = arith.constant 0 : index
    %c0_31 = arith.constant 0 : index
    %c0_32 = arith.constant 0 : index
    %39 = vector.load %arg11[%c0_30, %c0_31, %c0_32] : memref<1x16x128xf32, #tpu.memory_space<vmem>>, vector<1x16x128xf32>
    %40 = vector.shape_cast %39 : vector<1x16x128xf32> to vector<16x128xf32>
    %41 = vector.shape_cast %38 : vector<16x128xf32> to vector<1x16x128xf32>
    tpu.vector_store %arg11[%c0_30, %c0_31, %c0_32], %41 {strides = array<i32>} : memref<1x16x128xf32, #tpu.memory_space<vmem>>, vector<1x16x128xf32>,
    return
  }
  func.func @transform_0(%arg0: i32) -> (i32, i32, i32) {
    %c0_i32 = arith.constant 0 : i32
    %c0_i32_0 = arith.constant 0 : i32
    %c0_i32_1 = arith.constant 0 : i32
    return %arg0, %c0_i32, %c0_i32_0 : i32, i32, i32
  }
  func.func @transform_1(%arg0: i32) -> (i32, i32, i32) {
    %c0_i32 = arith.constant 0 : i32
    %c0_i32_0 = arith.constant 0 : i32
    %c0_i32_1 = arith.constant 0 : i32
    return %arg0, %c0_i32, %c0_i32_0 : i32, i32, i32
  }
  func.func @transform_2(%arg0: i32) -> (i32, i32) {
    %c0_i32 = arith.constant 0 : i32
    %c0_i32_0 = arith.constant 0 : i32
    %c0_i32_1 = arith.constant 0 : i32
    return %c0_i32, %c0_i32_0 : i32, i32
  }
  func.func @transform_3(%arg0: i32) -> (i32, i32) {
    %c0_i32 = arith.constant 0 : i32
    %c0_i32_0 = arith.constant 0 : i32
    %c0_i32_1 = arith.constant 0 : i32
    return %c0_i32, %c0_i32_0 : i32, i32
  }
  func.func @transform_4(%arg0: i32) -> (i32, i32) {
    %c0_i32 = arith.constant 0 : i32
    %c0_i32_0 = arith.constant 0 : i32
    %c0_i32_1 = arith.constant 0 : i32
    return %c0_i32, %c0_i32_0 : i32, i32
  }
  func.func @transform_5(%arg0: i32) -> (i32, i32) {
    %c0_i32 = arith.constant 0 : i32
    %c0_i32_0 = arith.constant 0 : i32
    %c0_i32_1 = arith.constant 0 : i32
    return %c0_i32, %c0_i32_0 : i32, i32
  }
  func.func @transform_6(%arg0: i32) -> (i32, i32) {
    %c0_i32 = arith.constant 0 : i32
    %c0_i32_0 = arith.constant 0 : i32
    %c0_i32_1 = arith.constant 0 : i32
    return %c0_i32, %c0_i32_0 : i32, i32
  }
  func.func @transform_7(%arg0: i32) -> (i32, i32) {
    %c0_i32 = arith.constant 0 : i32
    %c0_i32_0 = arith.constant 0 : i32
    %c0_i32_1 = arith.constant 0 : i32
    return %c0_i32, %c0_i32_0 : i32, i32
  }
  func.func @transform_8(%arg0: i32) -> (i32, i32) {
    %c0_i32 = arith.constant 0 : i32
    %c0_i32_0 = arith.constant 0 : i32
    %c0_i32_1 = arith.constant 0 : i32
    return %c0_i32, %c0_i32_0 : i32, i32
  }
  func.func @transform_9(%arg0: i32) -> (i32, i32) {
    %c0_i32 = arith.constant 0 : i32
    %c0_i32_0 = arith.constant 0 : i32
    %c0_i32_1 = arith.constant 0 : i32
    return %c0_i32, %c0_i32_0 : i32, i32
  }
  func.func @transform_10(%arg0: i32) -> (i32, i32, i32) {
    %c0_i32 = arith.constant 0 : i32
    %c0_i32_0 = arith.constant 0 : i32
    %c0_i32_1 = arith.constant 0 : i32
    return %arg0, %c0_i32, %c0_i32_0 : i32, i32, i32
  }
}

</mosaic_0001>

<bundles_post_ra>
// kernel: tpu_custom_call.1
= control target key start
LH: loop header
LB: loop body
LE: loop exit
PB: predicated region body
PF: predicated region fallthrough
CT: control target
= control target key end

     0   :  { %15 = vsyncpa [#allocation3], 0  ;;  %s843_s0 = inlined_call_operand.hbm [shape: bf16[1,16,16], index: 0, kind: input, shape index: {}]   ;;  %s844_s1 = inlined_call_operand.vmem [shape: bf16[1,16,8], index: 1, kind: input, shape index: {}]   ;;  %s845_s2 = inlined_call_operand.vmem [shape: bf16[8,16], index: 2, kind: input, shape index: {}]   ;;  %s846_s3 = inlined_call_operand.vmem [shape: f32[1,16], index: 3, kind: input, shape index: {}]   ;;  %s847_s4 = inlined_call_operand.hbm [shape: bf16[16,32], index: 4, kind: input, shape index: {}]   ;;  %s848_s5 = inlined_call_operand.vmem [shape: f32[1,32], index: 5, kind: input, shape index: {}]   ;;  %s849_s6 = inlined_call_operand.vmem [shape: bf16[32,64], index: 6, kind: input, shape index: {}]   ;;  %s850_s7 = inlined_call_operand.vmem [shape: f32[1,64], index: 7, kind: input, shape index: {}]   ;;  %s851_s8 = inlined_call_operand.hbm [shape: bf16[64,128], index: 8, kind: input, shape index: {}]   ;;  %s852_s9 = inlined_call_operand.vmem [shape: f32[1,128], index: 9, kind: input, shape index: {}]   ;;  %s853_s10 = inlined_call_operand.hbm [shape: f32[1,16,128], index: 10, kind: output, shape index: {}]  }
   0x1   :  { %16 = vsyncpa [#allocation6], 0 }
   0x2   :  { %17 = vsyncpa [#allocation4], 0  ;;  %s713_s13 = smov [#allocation5]   ;;  %s714_s15 = smov [#allocation2]  }
   0x3   :  { %s41_s14 = sshll.u32 %s713_s13, 4  ;;  %s23_s16 = sshll.u32 %s714_s15, 4  ;;  %s42_s14 = int_to_ptr.vmem [resolvable:$true] %s41_s14  ;;  %s24_s16 = int_to_ptr.vmem [resolvable:$true] %s23_s16 }
   0x4   :  { %s635_s17 = scalar_lea.vmem %s42_s14, 128  ;;  %p640_p1 = scmp.lt.s32.totalorder %s42_s14, %s42_s14 }
   0x5   :  { %p636_p0 = scmp.ne.s32.totalorder %s42_s14, %s635_s17  ;;  %p641_p2 = scmp.lt.s32.totalorder %s635_s17, %s635_s17 }
   0x7   :  { %p642_p3 = por %p641_p2, %p640_p1 }
   0x9   :  { %p643_p4 = pnand %p642_p3, %p636_p0 }
   0xb   :  { %646 = shalt.err (!%p643_p4)
}
   0xc   :  { %s715_s18 = smov 64   ;;  %s716_s19 = smov 4  }
   0xd   :  { %47 = dma.hbm_to_vmem [thread:$0]  %s847_s4, 128, %s42_s14, [#allocation6], %s715_s18, %s715_s18, %s716_s19  }
   0xe   :  { %s655_s22 = scalar_lea.vmem %s24_s16, 128  ;;  %p660_p6 = scmp.lt.s32.totalorder %s24_s16, %s24_s16 }
   0xf   :  { %p656_p5 = scmp.ne.s32.totalorder %s24_s16, %s655_s22  ;;  %p661_p7 = scmp.lt.s32.totalorder %s655_s22, %s655_s22 }
  0x11   :  { %p662_p8 = por %p661_p7, %p660_p6 }
  0x13   :  { %p663_p9 = pnand %p662_p8, %p656_p5 }
  0x15   :  { %666 = shalt.err (!%p663_p9)
}
  0x16   :  { %29 = dma.hbm_to_vmem [thread:$0]  %s843_s0, 128, %s24_s16, [#allocation3], %s715_s18, %s715_s18, %s716_s19  }
  0x17   :  { %s717_s25 = smov [#allocation7]  }
  0x18   :  { %s59_s26 = sshll.u32 %s717_s25, 4  ;;  %s60_s26 = int_to_ptr.vmem [resolvable:$true] %s59_s26 }
  0x19   :  { %s675_s27 = scalar_lea.vmem %s60_s26, 512  ;;  %p680_p11 = scmp.lt.s32.totalorder %s60_s26, %s60_s26 }
  0x1a   :  { %p676_p10 = scmp.ne.s32.totalorder %s60_s26, %s675_s27  ;;  %p681_p12 = scmp.lt.s32.totalorder %s675_s27, %s675_s27 }
  0x1c   :  { %p682_p13 = por %p681_p12, %p680_p11 }
  0x1e   :  { %p683_p0 = pnand %p682_p13, %p676_p10 }
  0x20   :  { %686 = shalt.err (!%p683_p0)
}
  0x21   :  { %65 = dma.hbm_to_vmem [thread:$0]  %s851_s8, 512, %s60_s26, [#allocation6], %s715_s18, %s715_s18, %s716_s19  }
  0x22   :  { %707 = dma.done.wait [#allocation3], 128  }
  0x23   :  { %708 = vsyncadd [#allocation3], 4294967168 }
  0x24   :  { %709 = dma.done.wait [#allocation6], 640  }
  0x25   :  { %710 = vsyncadd [#allocation6], 4294966656  ;;  %v718_v0 = vmov 0.0   ;;  %vm719_vm0 = vmmov 0   ;;  %v618_v1 = vld [vmem:[%s844_s1] sm:$0xff]   ;;  %vm93_vm1 = vcmask 130048  }
  0x26   :  { %558 = vmatprep.subr.bf16.mxu1 %v718_v0  ;;  %560 = vmatprep.mubr.msk.bf16.mxu1 %vm719_vm0, %v718_v0  ;;  %v619_v2 = vld [vmem:[#allocation2] sm:$0xff]   ;;  %vm151_vm2 = vcmask 1043456   ;;  %vm147_vm3 = vcmask 64512   ;;  %v620_v20 = vld [vmem:[#allocation5] sm:$0xff]   ;;  %vm368_vm4 = vcmask 261120   ;;  %v625_v45 = vld [vmem:[#allocation7 + $0x8] sm:$0xff]  }
  0x27   :  { %570 = vmatprep.subr.bf16.mxu0 %v718_v0  ;;  %572 = vmatprep.mubr.msk.bf16.mxu0 %vm719_vm0, %v718_v0  ;;  %v139_v3 = vld [vmem:[%s845_s2] sm:$0xf]  ;;  %v621_v36 = vld [vmem:[%s849_s6 + $0x8] sm:$0xff]   ;;  %v626_v46 = vld [vmem:[#allocation7] sm:$0xff]   ;;  %vm455_vm5 = vcmask 523264   ;;  %s720_s18 = smov [#allocation8]  }
  0x28   :  { %559 = vmatpush3.bf16.msra.mxu1 %v618_v1  ;;  %v153_v4 = vsel %vm151_vm2, %v139_v3, 0  ;;  %v523_v10 = vld [vmem:[%s846_s3] ss:$0 sm:$0xff]  ;;  %v623_v38 = vld [vmem:[#allocation7 + $0x18] sm:$0xff]   ;;  %s507_s19 = sshll.u32 %s720_s18, 4  ;;  %s508_s19 = int_to_ptr.vmem [resolvable:$true] %s507_s19 }
  0x29   :  { %564 = vmatprep.subr.bf16.mxu1 %v718_v0  ;;  %v526_v26 = vld [vmem:[%s848_s5] ss:$0 sm:$0xff]  ;;  %p692_p2 = scmp.lt.s32.totalorder %s508_s19, %s508_s19 }
  0x2a   :  { %v622_v37 = vld [vmem:[%s849_s6] sm:$0xff]  }
  0x2b   :  { %561 = vmatmul.mubr.msk.bf16.vlgmr.msra.gmra.mxu1 %vm93_vm1, %v619_v2  ;;  %v624_v44 = vld [vmem:[#allocation7 + $0x10] sm:$0xff]  }
  0x2c   :  { %566 = vmatprep.mubr.msk.bf16.mxu1 %vm719_vm0, %v718_v0  ;;  %565 = vmatpush3.bf16.msra.mxu1 %v153_v4  ;;  %v530_v47 = vld [vmem:[%s850_s7] ss:$0 sm:$0xff]  ;;  %s687_s7 = scalar_lea.vmem %s508_s19, 256 }
  0x2d   :  { %576 = vmatprep.subr.bf16.mxu1 %v718_v0  ;;  %v534_v57 = vld [vmem:[%s852_s9] ss:$0 sm:$0xff]  ;;  %p688_p1 = scmp.ne.s32.totalorder %s508_s19, %s687_s7  ;;  %p693_p3 = scmp.lt.s32.totalorder %s687_s7, %s687_s7 }
  0x2f   :  { %p694_p4 = por %p693_p3, %p692_p2 }
  0x31   :  { %p695_p5 = pnand %p694_p4, %p688_p1 }
  0xeb   :  { %v131_v5 = vpop.f32.mrf.mxu1 }
  0xed   :  { %v562_v6 = vpop.f32.mrf.mxu1 }
  0xef   :  { %v134_v7 = vpop.f32.mrf.mxu1 }
  0xf0   :  { %v138_v8 = vpack.c.bf16 %v134_v7, %v131_v5 }
  0xf1   :  { %v563_v9 = vpop.f32.mrf.mxu1 }
  0xf2   :  { %567 = vmatmul.mubr.msk.bf16.vlgmr.msra.gmra.mxu1 %vm147_vm3, %v138_v8 }
  0xf3   :  { %578 = vmatprep.mubr.msk.bf16.mxu1 %vm719_vm0, %v718_v0  ;;  %577 = vmatpush3.bf16.msra.mxu1 %v620_v20 }
  0xf4   :  { %588 = vmatprep.subr.bf16.mxu1 %v718_v0 }
 0x1b2   :  { %v189_v11 = vpop.f32.mrf.mxu1 }
 0x1b3   :  { %v190_v13 = vadd.f32 %v523_v10, %v189_v11 }
 0x1b4   :  { %v568_v12 = vpop.f32.mrf.mxu1 }
 0x1b5   :  { %v196_v17 = vmax.f32 %v190_v13, 0.0 }
 0x1b6   :  { %v192_v14 = vpop.f32.mrf.mxu1 }
 0x1b7   :  { %v193_v15 = vadd.f32 %v523_v10, %v192_v14 }
 0x1b8   :  { %v569_v16 = vpop.f32.mrf.mxu1 }
 0x1b9   :  { %v197_v18 = vmax.f32 %v193_v15, 0.0 }
 0x1bb   :  { %v198_v19 = vpack.c.bf16 %v197_v18, %v196_v17 }
 0x1bd   :  { %571 = vmatpush3.bf16.msra.mxu0 %v198_v19 }
 0x1be   :  { %582 = vmatprep.subr.bf16.mxu0 %v718_v0 }
 0x1c0   :  { %573 = vmatmul.mubr.msk.bf16.vlgmr.msra.gmra.mxu0 %vm93_vm1, %v619_v2 }
 0x1c1   :  { %584 = vmatprep.mubr.msk.bf16.mxu0 %vm719_vm0, %v718_v0 }
 0x280   :  { %v233_v21 = vpop.f32.mrf.mxu0 }
 0x282   :  { %v574_v22 = vpop.f32.mrf.mxu0 }
 0x284   :  { %v236_v23 = vpop.f32.mrf.mxu0 }
 0x285   :  { %v240_v24 = vpack.c.bf16 %v236_v23, %v233_v21 }
 0x286   :  { %v575_v25 = vpop.f32.mrf.mxu0 }
 0x287   :  { %579 = vmatmul.mubr.msk.bf16.vlgmr.msra.gmra.mxu1 %vm93_vm1, %v240_v24 }
 0x288   :  { %592 = vmatprep.mubr.msk.bf16.mxu1 %vm719_vm0, %v718_v0  ;;  %589 = vmatpush3.bf16.msra.mxu1 %v621_v36 }
 0x289   :  { %590 = vmatprep.subr.bf16.mxu1 %v718_v0 }
 0x28c   :  { %591 = vmatpush3.bf16.msra.mxu1 %v622_v37 }
 0x347   :  { %v293_v27 = vpop.f32.mrf.mxu1 }
 0x348   :  { %v294_v29 = vadd.f32 %v526_v26, %v293_v27 }
 0x349   :  { %v580_v28 = vpop.f32.mrf.mxu1 }
 0x34a   :  { %v300_v33 = vmax.f32 %v294_v29, 0.0 }
 0x34b   :  { %v296_v30 = vpop.f32.mrf.mxu1 }
 0x34c   :  { %v297_v31 = vadd.f32 %v526_v26, %v296_v30 }
 0x34d   :  { %v581_v32 = vpop.f32.mrf.mxu1 }
 0x34e   :  { %v301_v34 = vmax.f32 %v297_v31, 0.0 }
 0x350   :  { %v302_v35 = vpack.c.bf16 %v301_v34, %v300_v33 }
 0x352   :  { %583 = vmatpush3.bf16.msra.mxu0 %v302_v35 }
 0x353   :  { %596 = vmatprep.subr.bf16.mxu0 %v718_v0 }
 0x355   :  { %585 = vmatmul.mubr.msk.bf16.vlgmr.msra.gmra.mxu0 %vm93_vm1, %v619_v2 }
 0x356   :  { %604 = vmatprep.mubr.msk.bf16.mxu0 %vm719_vm0, %v718_v0  ;;  %597 = vmatpush3.bf16.msra.mxu0 %v623_v38 }
 0x357   :  { %598 = vmatprep.subr.bf16.mxu0 %v718_v0 }
 0x35a   :  { %599 = vmatpush3.bf16.msra.mxu0 %v624_v44 }
 0x35b   :  { %600 = vmatprep.subr.bf16.mxu0 %v718_v0 }
 0x35e   :  { %601 = vmatpush3.bf16.msra.mxu0 %v625_v45 }
 0x35f   :  { %602 = vmatprep.subr.bf16.mxu0 %v718_v0 }
 0x362   :  { %603 = vmatpush3.bf16.msra.mxu0 %v626_v46 }
 0x415   :  { %v337_v39 = vpop.f32.mrf.mxu0 }
 0x417   :  { %v586_v40 = vpop.f32.mrf.mxu0 }
 0x419   :  { %v340_v41 = vpop.f32.mrf.mxu0 }
 0x41a   :  { %v344_v42 = vpack.c.bf16 %v340_v41, %v337_v39 }
 0x41b   :  { %v587_v43 = vpop.f32.mrf.mxu0 }
 0x41c   :  { %593 = vmatmul.mubr.msk.bf16.vlgmr.msra.gmra.mxu1 %vm368_vm4, %v344_v42 }
 0x4dc   :  { %v406_v48 = vpop.f32.mrf.mxu1 }
 0x4dd   :  { %v407_v50 = vadd.f32 %v530_v47, %v406_v48 }
 0x4de   :  { %v594_v49 = vpop.f32.mrf.mxu1 }
 0x4df   :  { %v413_v54 = vmax.f32 %v407_v50, 0.0 }
 0x4e0   :  { %v409_v51 = vpop.f32.mrf.mxu1 }
 0x4e1   :  { %v410_v52 = vadd.f32 %v530_v47, %v409_v51 }
 0x4e2   :  { %v595_v53 = vpop.f32.mrf.mxu1 }
 0x4e3   :  { %v414_v55 = vmax.f32 %v410_v52, 0.0 }
 0x4e5   :  { %v415_v56 = vpack.c.bf16 %v414_v55, %v413_v54 }
 0x4e7   :  { %605 = vmatmul.mubr.msk.bf16.vlgmr.msra.gmra.mxu0 %vm455_vm5, %v415_v56 }
 0x5a7   :  { %v493_v58 = vpop.f32.mrf.mxu0 }
 0x5a8   :  { %v494_v59 = vadd.f32 %v534_v57, %v493_v58 }
 0x5a9   :  { %v606_v60 = vpop.f32.mrf.mxu0 }
 0x5aa   :  { %500 = vst [vmem:[#allocation8] sm:$0xff] %v494_v59 }
 0x5ab   :  { %v496_v61 = vpop.f32.mrf.mxu0 }
 0x5ac   :  { %v497_v62 = vadd.f32 %v534_v57, %v496_v61 }
 0x5ad   :  { %v607_v63 = vpop.f32.mrf.mxu0 }
 0x5ae   :  { %501 = vst [vmem:[#allocation8 + $0x8] sm:$0xff] %v497_v62 }
 0x5af   :  { %698 = shalt.err (!%p695_p5)
}
 0x5b0   :  { %s721_s20 = smov 128   ;;  %s722_s9 = smov 8  }
 0x5b1   :  { %513 = dma.vmem_to_hbm [thread:$0]  %s508_s19, 256, %s853_s10, [#allocation4], %s721_s20, %s721_s20, %s722_s9  }
 0x5b2   :  { %711 = dma.done.wait [#allocation4], 256  }
 0x5b3   :  { %712 = vsyncadd [#allocation4], 4294967040 }
 0x5b4   :  { %517 = vsyncpa [#allocation3], 1 }
 0x5b5   :  { %518 = vsyncpa [#allocation6], 1 }
 0x5b6   :  { %519 = vsyncpa [#allocation4], 1 }

</bundles_post_ra>
